<compile_context>
chip_gen: v7x
topology: tpu7x:2x2x1
jax: 0.10.0
libtpu: 0.0.40
codegen_flags: <defaults>
</compile_context>

<pallas_src>
import functools

import jax
import jax.numpy as jnp
from jax.experimental import pallas as pl
from jax.experimental.pallas import tpu as pltpu


def _margin2_kernel(score_ref, sum_ref, out_ref, *, margin):
    # In-kernel cast: free VPU op, avoids an HBM round trip for non-f32 inputs.
    score = score_ref[...].astype(jnp.float32)   # (B, N)
    sum_s = sum_ref[...].astype(jnp.float32)     # (B, 1)
    b, n = score.shape

    # ---- Pairwise constants, built exactly once (hoisted; JAX does not CSE broadcasts).
    row = jax.lax.broadcasted_iota(jnp.int32, (n, n), 0)   # j (pos index)
    col = jax.lax.broadcasted_iota(jnp.int32, (n, n), 1)   # k (neg index)
    delta = col - row                                      # i = k - j
    valid = jnp.logical_and(delta >= 1, delta <= n - 2)
    deltaf = delta.astype(jnp.float32)
    margin_mat = deltaf * jnp.float32(margin)              # margin * i
    # weight = 1 / (B * (N - i)) on valid pairs, 0 elsewhere (denominator never 0).
    weight_mat = jnp.where(
        valid, 1.0 / (jnp.float32(b) * (jnp.float32(n) - deltaf)), 0.0)

    # ---- Single-pass pairwise hinge: diff[b, j, k] = score[b, k] - score[b, j].
    diff = score[:, None, :] - score[:, :, None]           # (B, N, N)
    hinge = jnp.maximum(diff + margin_mat[None, :, :], 0.0)
    pair_term = jnp.sum(hinge * weight_mat[None, :, :])    # one reduction for all i terms

    # ---- Final term: MarginRankingLoss(0)(sum_score broadcast, score, 1)
    #      = mean(relu(score - sum_score[:, None])) over B*N elements.
    last_term = jnp.sum(jnp.maximum(score - sum_s, 0.0)) * jnp.float32(1.0 / (b * n))

    # (The i == 0 term, MarginRankingLoss(0)(score, score, 1), is identically 0.)
    out_ref[0, 0] = pair_term + last_term


def margin2_loss(sum_score, score, margin):
    """sum_score: (B,), score: (B, N) -> scalar loss (float32)."""
    b, n = score.shape
    sum_2d = sum_score.reshape(b, 1)   # metadata-only reshape; dtype cast happens in-kernel

    kernel = functools.partial(_margin2_kernel, margin=float(margin))

    # Advisory cost: ~5 ops per (b, j, k) pair + ~3 per element of the final term.
    flops = 5 * b * n * n + 3 * b * n
    bytes_accessed = (score.size * score.dtype.itemsize
                      + sum_2d.size * sum_2d.dtype.itemsize + 4)

    out = pl.pallas_call(
        kernel,
        out_shape=jax.ShapeDtypeStruct((1, 1), jnp.float32),
        in_specs=[
            pl.BlockSpec(memory_space=pltpu.MemorySpace.VMEM),
            pl.BlockSpec(memory_space=pltpu.MemorySpace.VMEM),
        ],
        out_specs=pl.BlockSpec(memory_space=pltpu.MemorySpace.SMEM),
        cost_estimate=pl.CostEstimate(
            flops=flops, transcendentals=0, bytes_accessed=bytes_accessed),
    )(score, sum_2d)
    return out[0, 0]


def margin2_loss_ref(sum_score, score, margin):
    """Pure-JAX reference mirroring the PyTorch forward (loop form)."""
    score = score.astype(jnp.float32)
    sum_score = sum_score.astype(jnp.float32)
    n = score.shape[1]
    total = jnp.float32(0.0)  # MarginRankingLoss(0)(score, score, 1) == 0
    for i in range(1, n - 1):
        pos = score[:, : n - i].reshape(-1)
        neg = score[:, i:].reshape(-1)
        total = total + jnp.mean(jnp.maximum(neg - pos + margin * i, 0.0))
    total = total + jnp.mean(jnp.maximum(score - sum_score[:, None], 0.0))
    return total


if __name__ == "__main__":
    B, N = 2, 8          # batch=2, number of ranking scores per example=8
    MARGIN = 0.1         # module __init__ hyperparameter (deterministic)

    key = jax.random.PRNGKey(0)
    k1, k2 = jax.random.split(key)
    score = jax.random.normal(k1, (B, N), dtype=jnp.float32)
    sum_score = jax.random.normal(k2, (B,), dtype=jnp.float32)

    loss = jax.block_until_ready(margin2_loss(sum_score, score, MARGIN))
    ref = jax.block_until_ready(margin2_loss_ref(sum_score, score, MARGIN))

    assert jnp.allclose(loss, ref, atol=1e-5, rtol=1e-5), (loss, ref)
    print("KERNEL_OK")
</pallas_src>

<mosaic_0001>
module attributes {stable_mosaic.version = 11 : i64} {
  func.func @_margin2_kernel(%arg0: memref<2x8xf32, #tpu.memory_space<vmem>>, %arg1: memref<2x1xf32, #tpu.memory_space<vmem>>, %arg2: memref<1x1xf32, #tpu.memory_space<smem>>) attributes {dimension_semantics = [], scalar_prefetch = 0 : i64, scratch_operands = 0 : i64, tpu.core_type = #tpu.core_type<tc>} {
    %c0 = arith.constant 0 : index
    %c0_0 = arith.constant 0 : index
    %0 = vector.load %arg0[%c0, %c0_0] : memref<2x8xf32, #tpu.memory_space<vmem>>, vector<2x8xf32>
    %c0_1 = arith.constant 0 : index
    %c0_2 = arith.constant 0 : index
    %1 = vector.load %arg1[%c0_1, %c0_2] : memref<2x1xf32, #tpu.memory_space<vmem>>, vector<2x1xf32>
    %2 = tpu.iota {dimensions = array<i32: 0>} : vector<8x8xi32>
    %3 = tpu.iota {dimensions = array<i32: 1>} : vector<8x8xi32>
    %4 = arith.subi %3, %2 : vector<8x8xi32>
    %c1_i32 = arith.constant 1 : i32
    %5 = vector.broadcast %c1_i32 : i32 to vector<8x8xi32>
    %6 = arith.cmpi sge, %4, %5 : vector<8x8xi32>
    %c6_i32 = arith.constant 6 : i32
    %7 = vector.broadcast %c6_i32 : i32 to vector<8x8xi32>
    %8 = arith.cmpi sle, %4, %7 : vector<8x8xi32>
    %9 = arith.andi %6, %8 : vector<8x8xi1>
    %10 = arith.sitofp %4 : vector<8x8xi32> to vector<8x8xf32>
    %cst = arith.constant 1.000000e-01 : f32
    %11 = vector.broadcast %cst : f32 to vector<8x8xf32>
    %12 = arith.mulf %10, %11 : vector<8x8xf32>
    %cst_3 = arith.constant 8.000000e+00 : f32
    %13 = vector.broadcast %cst_3 : f32 to vector<8x8xf32>
    %14 = arith.subf %13, %10 : vector<8x8xf32>
    %cst_4 = arith.constant 2.000000e+00 : f32
    %15 = vector.broadcast %cst_4 : f32 to vector<8x8xf32>
    %16 = arith.mulf %15, %14 : vector<8x8xf32>
    %cst_5 = arith.constant 1.000000e+00 : f32
    %17 = vector.broadcast %cst_5 : f32 to vector<8x8xf32>
    %18 = arith.divf %17, %16 : vector<8x8xf32>
    %cst_6 = arith.constant 0.000000e+00 : f32
    %19 = vector.broadcast %cst_6 : f32 to vector<8x8xf32>
    %20 = arith.select %9, %18, %19 : vector<8x8xi1>, vector<8x8xf32>
    %21 = vector.shape_cast %0 : vector<2x8xf32> to vector<2x1x8xf32>
    %22 = vector.shape_cast %0 : vector<2x8xf32> to vector<2x8x1xf32>
    %23 = vector.broadcast %21 : vector<2x1x8xf32> to vector<2x8x8xf32>
    %24 = vector.broadcast %22 : vector<2x8x1xf32> to vector<2x8x8xf32>
    %25 = arith.subf %23, %24 : vector<2x8x8xf32>
    %26 = vector.shape_cast %12 : vector<8x8xf32> to vector<1x8x8xf32>
    %27 = vector.broadcast %26 : vector<1x8x8xf32> to vector<2x8x8xf32>
    %28 = arith.addf %25, %27 : vector<2x8x8xf32>
    %cst_7 = arith.constant 0.000000e+00 : f32
    %29 = vector.broadcast %cst_7 : f32 to vector<2x8x8xf32>
    %30 = arith.maximumf %28, %29 : vector<2x8x8xf32>
    %31 = vector.shape_cast %20 : vector<8x8xf32> to vector<1x8x8xf32>
    %32 = vector.broadcast %31 : vector<1x8x8xf32> to vector<2x8x8xf32>
    %33 = arith.mulf %30, %32 : vector<2x8x8xf32>
    %34 = vector.shape_cast %33 : vector<2x8x8xf32> to vector<1x2x8x8xf32>
    %cst_8 = arith.constant dense<0.000000e+00> : vector<1xf32>
    %35 = vector.multi_reduction <add>, %34, %cst_8 [1, 2, 3] : vector<1x2x8x8xf32> to vector<1xf32>
    %36 = vector.shape_cast %35 : vector<1xf32> to vector<1x1x1x1xf32>
    %37 = vector.extract %36[0, 0, 0, 0] : f32 from vector<1x1x1x1xf32>
    %38 = vector.broadcast %1 : vector<2x1xf32> to vector<2x8xf32>
    %39 = arith.subf %0, %38 : vector<2x8xf32>
    %cst_9 = arith.constant 0.000000e+00 : f32
    %40 = vector.broadcast %cst_9 : f32 to vector<2x8xf32>
    %41 = arith.maximumf %39, %40 : vector<2x8xf32>
    %42 = vector.shape_cast %41 : vector<2x8xf32> to vector<1x2x8xf32>
    %cst_10 = arith.constant dense<0.000000e+00> : vector<1xf32>
    %43 = vector.multi_reduction <add>, %42, %cst_10 [1, 2] : vector<1x2x8xf32> to vector<1xf32>
    %44 = vector.shape_cast %43 : vector<1xf32> to vector<1x1x1xf32>
    %45 = vector.extract %44[0, 0, 0] : f32 from vector<1x1x1xf32>
    %cst_11 = arith.constant 6.250000e-02 : f32
    %46 = arith.mulf %45, %cst_11 : f32
    %47 = arith.addf %37, %46 : f32
    %c0_12 = arith.constant 0 : index
    %c0_13 = arith.constant 0 : index
    %48 = memref.load %arg2[%c0_12, %c0_13] : memref<1x1xf32, #tpu.memory_space<smem>>
    memref.store %47, %arg2[%c0_12, %c0_13] : memref<1x1xf32, #tpu.memory_space<smem>>
    return
  }
}

</mosaic_0001>

<bundles_post_ra>
// kernel: tpu_custom_call.1
= control target key start
LH: loop header
LB: loop body
LE: loop exit
PB: predicated region body
PF: predicated region fallthrough
CT: control target
= control target key end

     0   :  { %v14_v1 = vlaneseq  ;;  %v154_v2 = vmov 0   ;;  %s190_s0 = inlined_call_operand.vmem [shape: f32[2,8], index: 0, kind: input, shape index: {}]   ;;  %s191_s1 = inlined_call_operand.vmem [shape: f32[2,1], index: 1, kind: input, shape index: {}]   ;;  %s192_s2 = inlined_call_operand.hbm [shape: f32[1,1], index: 2, kind: output, shape index: {}]  }
   0x1   :  { %v13_v0 = vld [vmem:[%s191_s1] sm:$0x3]  ;;  %139 = vset.pattern.permute.xlu0 %v154_v2 }
   0x2   :  { %7 = vsyncpa [#allocation3], 0  ;;  %99 = vperm.xlu0 %139, %v13_v0   ;;  %v15_v3 = vshrl.u32 %v14_v1, 7  ;;  %v155_v4 = vmov 1966171168   ;;  %v17_v6 = vand.u32 127, %v14_v1 }
   0x3   :  { %v31_v5 = vunpack.c.l.s4 %v155_v4  ;;  %v12_v7 = vld [vmem:[%s190_s0] sm:$0x3]  ;;  %vm104_vm3 = vcmask 58368   ;;  %vm84_vm4 = vcmask 64512   ;;  %s142_s17 = scalar_lea.hbm %s192_s2, 16 }
   0x4   :  { %v61_v9 = vsub.s32 1, %v15_v3  ;;  %v54_v10 = vsub.s32 0, %v15_v3  ;;  %v18_v11 = vsub.s32 %v17_v6, %v15_v3  ;;  %p143_p0 = scmp.ne.s32.totalorder %s192_s2, %s142_s17  ;;  %p146_p1 = scmp.lt.u32.totalorder %s142_s17, %s192_s2 }
   0x5   :  { %v32_v8 = vunpack.c.0.s8 %v31_v5 }
   0x6   :  { %v62_v13 = vrot.slane %v12_v7, %v61_v9  ;;  %v55_v14 = vrot.slane %v12_v7, %v54_v10  ;;  %v22_v21 = vcvt.s32.f32 %v18_v11  ;;  %vm19_vm0 = vcmp.ge.s32.totalorder %v18_v11, 1  ;;  %p148_p2 = pnand %p146_p1, %p143_p0 }
   0x7   :  { %v35_v12 = vsub.s32 %v32_v8, %v15_v3  ;;  %vm20_vm1 = vcmp.le.s32.totalorder %v18_v11, 6 }
   0x8   :  { %64 = vbcast.lane.b32.xlu1 %v62_v13, 256  ;;  %57 = vbcast.lane.b32.xlu0 %v55_v14, 256  ;;  %v24_v22 = vsub.f32 8.0, %v22_v21  ;;  %v23_v24 = vmul.f32 0.1, %v22_v21  ;;  %vm21_vm2 = vmand %vm19_vm0, %vm20_vm1 }
   0x9   :  { %v36_v15 = vrot.slane %v12_v7, %v35_v12 }
   0xa   :  { %v25_v23 = vmul.f32 2.0, %v24_v22 }
   0xb   :  { %v37_v16 = vcombine.high %v36_v15, %v36_v15  ;;  %v44_v17 = vrot.slane %v36_v15, %v35_v12 }
   0xc   :  { %140 = vrcp.f32 %v25_v23 }
   0xd   :  { %v51_v18 = vrot.slane %v37_v16, %v35_v12  ;;  %v69_v19 = vrot.slane %v44_v17, %v54_v10 }
   0xf   :  { %v73_v20 = vrot.slane %v51_v18, %v54_v10 }
  0x16   :  { %v141_v26 = vpop.eup %140 }
  0x17   :  { %v28_v29 = vsel %vm21_vm2, %v141_v26, 0.0 }
  0x7a   :  { %v65_v25 = vpop.permute.xlu1 %64 }
  0x7b   :  { %v77_v27 = vsub.f32 %v73_v20, %v65_v25 }
  0x7d   :  { %v79_v28 = vadd.f32 %v77_v27, %v23_v24 }
  0x7f   :  { %v81_v30 = vmax.f32 %v79_v28, 0.0 }
  0x81   :  { %v100_v31 = vpop.permute.xlu0 %99  ;;  %v83_v32 = vmul.f32 %v81_v30, %v28_v29 }
  0x82   :  { %v102_v33 = vsub.f32 %v12_v7, %v100_v31 }
  0x83   :  { %v86_v41 = vsel %vm84_vm4, %v83_v32, 0.0 }
  0x84   :  { %v103_v34 = vmax.f32 %v102_v33, 0.0 }
  0x85   :  { %v58_v35 = vpop.permute.xlu0 %57 }
  0x86   :  { %v76_v36 = vsub.f32 %v69_v19, %v58_v35  ;;  %v105_v37 = vsel %vm104_vm3, %v103_v34, 0.0 }
  0x87   :  { %106 = vadd.xlane.f32.xlu0 %v105_v37 }
  0x88   :  { %v78_v38 = vadd.f32 %v76_v36, %v23_v24 }
  0x8a   :  { %v80_v39 = vmax.f32 %v78_v38, 0.0 }
  0x8c   :  { %v82_v40 = vmul.f32 %v80_v39, %v28_v29 }
  0x8e   :  { %v85_v42 = vsel %vm84_vm4, %v82_v40, 0.0 }
  0x8f   :  { %v87_v43 = vadd.f32 %v86_v41, %v85_v42 }
  0x91   :  { %88 = vadd.xlane.f32.xlu1 %v87_v43 }
 0x114   :  { %v107_v44 = vpop.xlane.xlu0 %106 }
 0x115   :  { %v108_v45 = vrot.slane %v107_v44, 4 }
 0x117   :  { %v109_v46 = vadd.f32 %v108_v45, %v107_v44 }
 0x119   :  { %v110_v47 = vrot.slane %v109_v46, 2 }
 0x11b   :  { %v111_v51 = vadd.f32 %v110_v47, %v109_v46 }
 0x11d   :  { %v112_v54 = vrot.slane %v111_v51, 1 }
 0x11e   :  { %v89_v48 = vpop.xlane.xlu1 %88 }
 0x11f   :  { %v90_v49 = vrot.slane %v89_v48, 4  ;;  %v113_v57 = vadd.f32 %v112_v54, %v111_v51 }
 0x121   :  { %v91_v50 = vadd.f32 %v90_v49, %v89_v48 }
 0x123   :  { %v92_v52 = vrot.slane %v91_v50, 2 }
 0x125   :  { %v93_v53 = vadd.f32 %v92_v52, %v91_v50 }
 0x127   :  { %v94_v55 = vrot.slane %v93_v53, 1 }
 0x129   :  { %v95_v56 = vadd.f32 %v94_v55, %v93_v53 }
 0x12b   :  { %132 = vpush %v95_v56 }
 0x12c   :  { %134 = vpush %v113_v57 }
 0x15c   :  { %s133_s0 = spop %132 }
 0x15d   :  { %s135_s1 = spop %134 }
 0x15e   :  { %s115_s13 = smul.f32 0.0625, %s135_s1 }
 0x160   :  { %s116_s14 = sadd.f32 %s133_s0, %s115_s13 }
 0x162   :  { %118 = sst [smem:[#allocation2]] %s116_s14 }
 0x163   :  { %151 = shalt.err (!%p148_p2)
}
 0x164   :  { %s156_s22 = smov [#allocation2]  }
 0x165   :  { %126 = dma.smem_to_hbm %s156_s22, 16, %s192_s2, [#allocation3]  }
 0x166   :  { %152 = dma.done.wait [#allocation3], 16  }
 0x167   :  { %153 = vsyncadd [#allocation3], 4294967280 }
 0x168   :  { %130 = sfence }
 0x169   :  { %131 = vsyncpa [#allocation3], 1 }

</bundles_post_ra>
